<compile_context>
chip_gen: v7x
topology: tpu7x:2x2x1
jax: 0.10.0
libtpu: 0.0.40
codegen_flags: <defaults>
</compile_context>

<pallas_src>
import functools

import jax
import jax.numpy as jnp
from jax.experimental import pallas as pl
from jax.experimental.pallas import tpu as pltpu


def _split_heads(x2d, num_heads, head_dim):
    """(N, H*hd) -> (H, N, hd). Static lane slices: layout staging only, all matmuls stay head-batched."""
    return jnp.stack(
        [x2d[:, h * head_dim:(h + 1) * head_dim] for h in range(num_heads)], axis=0)


def _merge_heads(x3d):
    """(H, N, hd) -> (N, H*hd)  (concat heads along the feature dim)."""
    return jnp.concatenate([x3d[h] for h in range(x3d.shape[0])], axis=-1)


def temporal_attention_kernel(x_ref, gamma_ref, beta_ref, wq_ref, wkv_ref,
                              wout_ref, bout_ref, o_ref, k_scr, v_scr,
                              *, num_heads, eps, q_block):
    L, D = x_ref.shape[1], x_ref.shape[2]
    H = num_heads
    hd = D // H
    cdt = wq_ref.dtype                      # MXU compute dtype (bf16 by default)
    qi = pl.program_id(1)

    def layer_norm(xf):                     # xf: (N, D) float32
        mu = jnp.mean(xf, axis=-1, keepdims=True)
        xc = xf - mu
        var = jnp.mean(xc * xc, axis=-1, keepdims=True)
        return (xc * jax.lax.rsqrt(var + eps)) * gamma_ref[...] + beta_ref[...]

    # ---- K/V projection: once per batch element, persisted in VMEM scratch ----
    @pl.when(qi == 0)
    def _():
        xn_full = layer_norm(x_ref[0].astype(jnp.float32)).astype(cdt)     # (L, D)
        kv = jnp.dot(xn_full, wkv_ref[...],
                     preferred_element_type=jnp.float32)                   # (L, 2D) f32
        k_scr[...] = _split_heads(kv[:, :D], H, hd).astype(cdt)            # (H, L, hd)
        v_scr[...] = _split_heads(kv[:, D:], H, hd).astype(cdt)            # (H, L, hd)

    # ---- this query tile ----
    q0 = pl.multiple_of(qi * q_block, q_block)
    x_t = x_ref[0, pl.ds(q0, q_block), :].astype(jnp.float32)              # (TQ, D)
    xn_q = layer_norm(x_t).astype(cdt)
    q = jnp.dot(xn_q, wq_ref[...], preferred_element_type=jnp.float32)     # scale pre-folded
    qh = _split_heads(q, H, hd).astype(cdt)                                # (H, TQ, hd)

    # ---- scores + softmax (deferred normalization), all heads batched ----
    s = jnp.einsum('hqd,hkd->hqk', qh, k_scr[...],
                   preferred_element_type=jnp.float32)                     # (H, TQ, L) f32
    p = jnp.exp(s - jnp.max(s, axis=-1, keepdims=True))
    denom = jnp.sum(p, axis=-1, keepdims=True)                             # (H, TQ, 1)

    o = jnp.einsum('hqk,hkd->hqd', p.astype(cdt), v_scr[...],
                   preferred_element_type=jnp.float32)                     # (H, TQ, hd) f32
    o = o * pl.reciprocal(denom, approx=True)     # normalize the small tensor (EUP recip)
    attn = _merge_heads(o)                                                 # (TQ, D) f32

    # ---- output projection + residual ----
    out = jnp.dot(attn.astype(cdt), wout_ref[...],
                  preferred_element_type=jnp.float32) + bout_ref[...]
    o_ref[0] = (x_t + out).astype(o_ref.dtype)


def prepare_temporal_attention_params(gamma, beta, w_qkv, w_out, b_out, *,
                                      num_heads, compute_dtype=jnp.bfloat16):
    """One-time parameter prep (do NOT redo per call): transpose to y = x @ W form,
    fold 1/sqrt(head_dim) into the Q projection, split Q vs KV, pre-cast MXU weights."""
    D = gamma.shape[-1]
    hd = D // num_heads
    scale = hd ** (-0.5)
    w_qkv = jnp.asarray(w_qkv)
    wq_t = (w_qkv[:D] * scale).T.astype(compute_dtype)        # (D, D)   scaled Wq^T
    wkv_t = w_qkv[D:].T.astype(compute_dtype)                 # (D, 2D)  [Wk^T | Wv^T]
    wout_t = jnp.asarray(w_out).T.astype(compute_dtype)       # (D, D)   Wout^T
    gamma2 = jnp.asarray(gamma, jnp.float32).reshape(1, D)
    beta2 = jnp.asarray(beta, jnp.float32).reshape(1, D)
    bout2 = jnp.asarray(b_out, jnp.float32).reshape(1, D)
    return gamma2, beta2, wq_t, wkv_t, wout_t, bout2


def temporal_attention(x, params, *, num_heads, eps=1e-5, q_block=None,
                       vmem_limit_bytes=None):
    """x: (B, L, D). params from prepare_temporal_attention_params.
    q_block (query tile) must divide L and be a multiple of 8 (or equal L)."""
    gamma2, beta2, wq_t, wkv_t, wout_t, bout2 = params
    B, L, D = x.shape
    H = num_heads
    hd = D // H
    assert hd * H == D

    if q_block is None:
        q_block = L
        if L > 512:
            for cand in (512, 256, 128):
                if L % cand == 0:
                    q_block = cand
                    break
    assert L % q_block == 0 and (q_block == L or q_block % 8 == 0)
    nq = L // q_block

    if vmem_limit_bytes is None:
        csz = jnp.dtype(wq_t.dtype).itemsize
        xsz = jnp.dtype(x.dtype).itemsize
        est = (2 * (4 * D * D) * csz                     # weight blocks (double-buffered)
               + 2 * L * D * xsz                         # x block
               + 2 * q_block * D * xsz                   # out block
               + 2 * H * L * max(hd, 128) * csz          # K/V scratch (lane-padded)
               + 2 * H * q_block * L * 4                 # scores + probs (f32)
               + 8 * L * D * 4)                          # misc f32 intermediates
        vmem_limit_bytes = int(min(max(2 * est, 32 * 1024 * 1024), 64 * 1024 * 1024))

    kernel = functools.partial(temporal_attention_kernel, num_heads=H, eps=eps,
                               q_block=q_block)

    return pl.pallas_call(
        kernel,
        out_shape=jax.ShapeDtypeStruct((B, L, D), x.dtype),
        grid=(B, nq),
        in_specs=[
            pl.BlockSpec((1, L, D), lambda b, q: (b, 0, 0)),      # x (full seq of this batch)
            pl.BlockSpec((1, D), lambda b, q: (0, 0)),            # LN gamma
            pl.BlockSpec((1, D), lambda b, q: (0, 0)),            # LN beta
            pl.BlockSpec((D, D), lambda b, q: (0, 0)),            # Wq^T (scale folded, bf16)
            pl.BlockSpec((D, 2 * D), lambda b, q: (0, 0)),        # Wkv^T (bf16)
            pl.BlockSpec((D, D), lambda b, q: (0, 0)),            # Wout^T (bf16)
            pl.BlockSpec((1, D), lambda b, q: (0, 0)),            # out-proj bias (f32)
        ],
        out_specs=pl.BlockSpec((1, q_block, D), lambda b, q: (b, q, 0)),
        scratch_shapes=[
            pltpu.VMEM((H, L, hd), wq_t.dtype),                   # K, head-major
            pltpu.VMEM((H, L, hd), wq_t.dtype),                   # V, head-major
        ],
        compiler_params=pltpu.CompilerParams(
            # K/V scratch is carried across the query-tile axis -> keep it "arbitrary";
            # batch axis is megacore-parallel.
            dimension_semantics=("parallel", "arbitrary"),
            vmem_limit_bytes=vmem_limit_bytes),
    )(x, gamma2, beta2, wq_t, wkv_t, wout_t, bout2)


def temporal_attention_ref(x, gamma, beta, w_qkv, w_out, b_out, *, num_heads, eps=1e-5):
    """Pure-JAX f32 reference matching the PyTorch forward (eval mode)."""
    B, L, D = x.shape
    hd = D // num_heads
    scale = hd ** (-0.5)
    mu = jnp.mean(x, axis=-1, keepdims=True)
    var = jnp.mean((x - mu) ** 2, axis=-1, keepdims=True)
    xn = (x - mu) / jnp.sqrt(var + eps) * gamma + beta
    qkv = xn @ w_qkv.T                                           # (B, L, 3D)
    qkv = qkv.reshape(B, L, 3, num_heads, hd).transpose(2, 0, 3, 1, 4)
    q, k, v = qkv[0], qkv[1], qkv[2]                             # (B, H, L, hd)
    s = jnp.einsum('bhqd,bhkd->bhqk', q, k) * scale
    p = jax.nn.softmax(s, axis=-1)
    a = jnp.einsum('bhqk,bhkd->bhqd', p, v)                      # (B, H, L, hd)
    a = a.transpose(0, 2, 1, 3).reshape(B, L, D)
    return x + (a @ w_out.T + b_out)


if __name__ == "__main__":
    B, L, D, H = 2, 8, 32, 4
    key = jax.random.PRNGKey(0)
    kx, kq, ko, kb, kg = jax.random.split(key, 5)

    x = jax.random.normal(kx, (B, L, D), dtype=jnp.float32)
    # deterministic synthetic parameters (shapes per the module __init__)
    w_qkv = jax.random.normal(kq, (3 * D, D), dtype=jnp.float32) * (D ** -0.5)
    w_out = jax.random.normal(ko, (D, D), dtype=jnp.float32) * (D ** -0.5)
    b_out = jax.random.normal(kb, (D,), dtype=jnp.float32) * 0.01
    gamma = 1.0 + 0.1 * jax.random.normal(kg, (D,), dtype=jnp.float32)
    beta = jnp.zeros((D,), dtype=jnp.float32) + 0.05

    params = prepare_temporal_attention_params(
        gamma, beta, w_qkv, w_out, b_out, num_heads=H)
    y = temporal_attention(x, params, num_heads=H)
    y = jax.block_until_ready(y)

    y_ref = temporal_attention_ref(x, gamma, beta, w_qkv, w_out, b_out, num_heads=H)
    assert y.shape == (B, L, D)
    # bf16 MXU operands + EUP approximate reciprocal -> bf16-level tolerance vs f32 ref.
    assert jnp.allclose(y, y_ref, atol=5e-2, rtol=5e-2), float(jnp.max(jnp.abs(y - y_ref)))

    print("KERNEL_OK")
</pallas_src>

<mosaic_0001>
module attributes {stable_mosaic.version = 11 : i64} {
  func.func @temporal_attention_kernel(%arg0: i32, %arg1: i32, %arg2: memref<1x8x32xf32, #tpu.memory_space<vmem>>, %arg3: memref<1x32xf32, #tpu.memory_space<vmem>>, %arg4: memref<1x32xf32, #tpu.memory_space<vmem>>, %arg5: memref<32x32xbf16, #tpu.memory_space<vmem>>, %arg6: memref<32x64xbf16, #tpu.memory_space<vmem>>, %arg7: memref<32x32xbf16, #tpu.memory_space<vmem>>, %arg8: memref<1x32xf32, #tpu.memory_space<vmem>>, %arg9: memref<1x8x32xf32, #tpu.memory_space<vmem>>, %arg10: memref<4x8x8xbf16, #tpu.memory_space<vmem>>, %arg11: memref<4x8x8xbf16, #tpu.memory_space<vmem>>) attributes {dimension_semantics = [#tpu.dimension_semantics<parallel>, #tpu.dimension_semantics<arbitrary>], iteration_bounds = array<i64: 2, 1>, scalar_prefetch = 0 : i64, scratch_operands = 2 : i64, tpu.core_type = #tpu.core_type<tc>, window_params = [{transform_indices = @transform_0, window_bounds = array<i64: 1, 8, 32>}, {pipeline_mode = #tpu.pipeline_mode<synchronous>, transform_indices = @transform_1, window_bounds = array<i64: 1, 32>}, {pipeline_mode = #tpu.pipeline_mode<synchronous>, transform_indices = @transform_2, window_bounds = array<i64: 1, 32>}, {pipeline_mode = #tpu.pipeline_mode<synchronous>, transform_indices = @transform_3, window_bounds = array<i64: 32, 32>}, {pipeline_mode = #tpu.pipeline_mode<synchronous>, transform_indices = @transform_4, window_bounds = array<i64: 32, 64>}, {pipeline_mode = #tpu.pipeline_mode<synchronous>, transform_indices = @transform_5, window_bounds = array<i64: 32, 32>}, {pipeline_mode = #tpu.pipeline_mode<synchronous>, transform_indices = @transform_6, window_bounds = array<i64: 1, 32>}, {transform_indices = @transform_7, window_bounds = array<i64: 1, 8, 32>}]} {
    %c0_i32 = arith.constant 0 : i32
    %0 = arith.cmpi eq, %arg1, %c0_i32 : i32
    %1 = arith.extui %0 : i1 to i32
    %c0_i32_0 = arith.constant 0 : i32
    %2 = arith.cmpi ne, %1, %c0_i32_0 : i32
    scf.if %2 {
      %c0_31 = arith.constant 0 : index
      %c0_32 = arith.constant 0 : index
      %c0_33 = arith.constant 0 : index
      %77 = vector.load %arg2[%c0_31, %c0_32, %c0_33] : memref<1x8x32xf32, #tpu.memory_space<vmem>>, vector<1x8x32xf32>
      %78 = vector.shape_cast %77 : vector<1x8x32xf32> to vector<8x32xf32>
      %cst_34 = arith.constant dense<0.000000e+00> : vector<8xf32>
      %79 = vector.multi_reduction <add>, %78, %cst_34 [1] : vector<8x32xf32> to vector<8xf32>
      %80 = vector.shape_cast %79 : vector<8xf32> to vector<8x1xf32>
      %cst_35 = arith.constant 3.200000e+01 : f32
      %81 = vector.broadcast %cst_35 : f32 to vector<8x1xf32>
      %82 = arith.divf %80, %81 : vector<8x1xf32>
      %83 = vector.broadcast %82 : vector<8x1xf32> to vector<8x32xf32>
      %84 = arith.subf %78, %83 : vector<8x32xf32>
      %85 = arith.mulf %84, %84 : vector<8x32xf32>
      %cst_36 = arith.constant dense<0.000000e+00> : vector<8xf32>
      %86 = vector.multi_reduction <add>, %85, %cst_36 [1] : vector<8x32xf32> to vector<8xf32>
      %87 = vector.shape_cast %86 : vector<8xf32> to vector<8x1xf32>
      %cst_37 = arith.constant 3.200000e+01 : f32
      %88 = vector.broadcast %cst_37 : f32 to vector<8x1xf32>
      %89 = arith.divf %87, %88 : vector<8x1xf32>
      %cst_38 = arith.constant 9.99999974E-6 : f32
      %90 = vector.broadcast %cst_38 : f32 to vector<8x1xf32>
      %91 = arith.addf %89, %90 : vector<8x1xf32>
      %92 = math.rsqrt %91 : vector<8x1xf32>
      %93 = vector.broadcast %92 : vector<8x1xf32> to vector<8x32xf32>
      %94 = arith.mulf %84, %93 : vector<8x32xf32>
      %c0_39 = arith.constant 0 : index
      %c0_40 = arith.constant 0 : index
      %95 = vector.load %arg3[%c0_39, %c0_40] : memref<1x32xf32, #tpu.memory_space<vmem>>, vector<1x32xf32>
      %96 = vector.broadcast %95 : vector<1x32xf32> to vector<8x32xf32>
      %97 = arith.mulf %94, %96 : vector<8x32xf32>
      %c0_41 = arith.constant 0 : index
      %c0_42 = arith.constant 0 : index
      %98 = vector.load %arg4[%c0_41, %c0_42] : memref<1x32xf32, #tpu.memory_space<vmem>>, vector<1x32xf32>
      %99 = vector.broadcast %98 : vector<1x32xf32> to vector<8x32xf32>
      %100 = arith.addf %97, %99 : vector<8x32xf32>
      %101 = arith.truncf %100 : vector<8x32xf32> to vector<8x32xbf16>
      %c0_43 = arith.constant 0 : index
      %c0_44 = arith.constant 0 : index
      %102 = vector.load %arg6[%c0_43, %c0_44] : memref<32x64xbf16, #tpu.memory_space<vmem>>, vector<32x64xbf16>
      %cst_45 = arith.constant dense<0.000000e+00> : vector<8x64xf32>
      %103 = tpu.matmul %101, %102, %cst_45 {dimension_numbers = #tpu.dot_dimension_numbers<[1], [0], [0], [1], [0, 0, 1, 1], [], []>} : vector<8x32xbf16>, vector<32x64xbf16>, vector<8x64xf32> -> vector<8x64xf32>
      %104 = vector.extract_strided_slice %103 {offsets = [0, 0], sizes = [8, 32], strides = [1, 1]} : vector<8x64xf32> to vector<8x32xf32>
      %105 = vector.extract_strided_slice %104 {offsets = [0, 0], sizes = [8, 8], strides = [1, 1]} : vector<8x32xf32> to vector<8x8xf32>
      %106 = vector.extract_strided_slice %104 {offsets = [0, 8], sizes = [8, 8], strides = [1, 1]} : vector<8x32xf32> to vector<8x8xf32>
      %107 = vector.extract_strided_slice %104 {offsets = [0, 16], sizes = [8, 8], strides = [1, 1]} : vector<8x32xf32> to vector<8x8xf32>
      %108 = vector.extract_strided_slice %104 {offsets = [0, 24], sizes = [8, 8], strides = [1, 1]} : vector<8x32xf32> to vector<8x8xf32>
      %109 = vector.shape_cast %105 : vector<8x8xf32> to vector<1x8x8xf32>
      %110 = vector.shape_cast %106 : vector<8x8xf32> to vector<1x8x8xf32>
      %111 = vector.shape_cast %107 : vector<8x8xf32> to vector<1x8x8xf32>
      %112 = vector.shape_cast %108 : vector<8x8xf32> to vector<1x8x8xf32>
      %113 = tpu.concatenate %109, %110, %111, %112 in 0 : vector<1x8x8xf32>, vector<1x8x8xf32>, vector<1x8x8xf32>, vector<1x8x8xf32> -> vector<4x8x8xf32>
      %114 = arith.truncf %113 : vector<4x8x8xf32> to vector<4x8x8xbf16>
      %c0_46 = arith.constant 0 : index
      %c0_47 = arith.constant 0 : index
      %c0_48 = arith.constant 0 : index
      %115 = vector.load %arg10[%c0_46, %c0_47, %c0_48] : memref<4x8x8xbf16, #tpu.memory_space<vmem>>, vector<4x8x8xbf16>
      tpu.vector_store %arg10[%c0_46, %c0_47, %c0_48], %114 {strides = array<i32>} : memref<4x8x8xbf16, #tpu.memory_space<vmem>>, vector<4x8x8xbf16>,
      %116 = vector.extract_strided_slice %103 {offsets = [0, 32], sizes = [8, 32], strides = [1, 1]} : vector<8x64xf32> to vector<8x32xf32>
      %117 = vector.extract_strided_slice %116 {offsets = [0, 0], sizes = [8, 8], strides = [1, 1]} : vector<8x32xf32> to vector<8x8xf32>
      %118 = vector.extract_strided_slice %116 {offsets = [0, 8], sizes = [8, 8], strides = [1, 1]} : vector<8x32xf32> to vector<8x8xf32>
      %119 = vector.extract_strided_slice %116 {offsets = [0, 16], sizes = [8, 8], strides = [1, 1]} : vector<8x32xf32> to vector<8x8xf32>
      %120 = vector.extract_strided_slice %116 {offsets = [0, 24], sizes = [8, 8], strides = [1, 1]} : vector<8x32xf32> to vector<8x8xf32>
      %121 = vector.shape_cast %117 : vector<8x8xf32> to vector<1x8x8xf32>
      %122 = vector.shape_cast %118 : vector<8x8xf32> to vector<1x8x8xf32>
      %123 = vector.shape_cast %119 : vector<8x8xf32> to vector<1x8x8xf32>
      %124 = vector.shape_cast %120 : vector<8x8xf32> to vector<1x8x8xf32>
      %125 = tpu.concatenate %121, %122, %123, %124 in 0 : vector<1x8x8xf32>, vector<1x8x8xf32>, vector<1x8x8xf32>, vector<1x8x8xf32> -> vector<4x8x8xf32>
      %126 = arith.truncf %125 : vector<4x8x8xf32> to vector<4x8x8xbf16>
      %c0_49 = arith.constant 0 : index
      %c0_50 = arith.constant 0 : index
      %c0_51 = arith.constant 0 : index
      %127 = vector.load %arg11[%c0_49, %c0_50, %c0_51] : memref<4x8x8xbf16, #tpu.memory_space<vmem>>, vector<4x8x8xbf16>
      tpu.vector_store %arg11[%c0_49, %c0_50, %c0_51], %126 {strides = array<i32>} : memref<4x8x8xbf16, #tpu.memory_space<vmem>>, vector<4x8x8xbf16>,
    } else {
    }
    %c8_i32 = arith.constant 8 : i32
    %3 = arith.muli %arg1, %c8_i32 : i32
    %4 = tpu.assume_multiple %3, 8 : i32
    %c0 = arith.constant 0 : index
    %5 = arith.index_cast %4 : i32 to index
    %c0_1 = arith.constant 0 : index
    %6 = vector.load %arg2[%c0, %5, %c0_1] : memref<1x8x32xf32, #tpu.memory_space<vmem>>, vector<1x8x32xf32>
    %7 = vector.shape_cast %6 : vector<1x8x32xf32> to vector<8x32xf32>
    %cst = arith.constant dense<0.000000e+00> : vector<8xf32>
    %8 = vector.multi_reduction <add>, %7, %cst [1] : vector<8x32xf32> to vector<8xf32>
    %9 = vector.shape_cast %8 : vector<8xf32> to vector<8x1xf32>
    %cst_2 = arith.constant 3.200000e+01 : f32
    %10 = vector.broadcast %cst_2 : f32 to vector<8x1xf32>
    %11 = arith.divf %9, %10 : vector<8x1xf32>
    %12 = vector.broadcast %11 : vector<8x1xf32> to vector<8x32xf32>
    %13 = arith.subf %7, %12 : vector<8x32xf32>
    %14 = arith.mulf %13, %13 : vector<8x32xf32>
    %cst_3 = arith.constant dense<0.000000e+00> : vector<8xf32>
    %15 = vector.multi_reduction <add>, %14, %cst_3 [1] : vector<8x32xf32> to vector<8xf32>
    %16 = vector.shape_cast %15 : vector<8xf32> to vector<8x1xf32>
    %cst_4 = arith.constant 3.200000e+01 : f32
    %17 = vector.broadcast %cst_4 : f32 to vector<8x1xf32>
    %18 = arith.divf %16, %17 : vector<8x1xf32>
    %cst_5 = arith.constant 9.99999974E-6 : f32
    %19 = vector.broadcast %cst_5 : f32 to vector<8x1xf32>
    %20 = arith.addf %18, %19 : vector<8x1xf32>
    %21 = math.rsqrt %20 : vector<8x1xf32>
    %22 = vector.broadcast %21 : vector<8x1xf32> to vector<8x32xf32>
    %23 = arith.mulf %13, %22 : vector<8x32xf32>
    %c0_6 = arith.constant 0 : index
    %c0_7 = arith.constant 0 : index
    %24 = vector.load %arg3[%c0_6, %c0_7] : memref<1x32xf32, #tpu.memory_space<vmem>>, vector<1x32xf32>
    %25 = vector.broadcast %24 : vector<1x32xf32> to vector<8x32xf32>
    %26 = arith.mulf %23, %25 : vector<8x32xf32>
    %c0_8 = arith.constant 0 : index
    %c0_9 = arith.constant 0 : index
    %27 = vector.load %arg4[%c0_8, %c0_9] : memref<1x32xf32, #tpu.memory_space<vmem>>, vector<1x32xf32>
    %28 = vector.broadcast %27 : vector<1x32xf32> to vector<8x32xf32>
    %29 = arith.addf %26, %28 : vector<8x32xf32>
    %30 = arith.truncf %29 : vector<8x32xf32> to vector<8x32xbf16>
    %c0_10 = arith.constant 0 : index
    %c0_11 = arith.constant 0 : index
    %31 = vector.load %arg5[%c0_10, %c0_11] : memref<32x32xbf16, #tpu.memory_space<vmem>>, vector<32x32xbf16>
    %cst_12 = arith.constant dense<0.000000e+00> : vector<8x32xf32>
    %32 = tpu.matmul %30, %31, %cst_12 {dimension_numbers = #tpu.dot_dimension_numbers<[1], [0], [0], [1], [0, 0, 1, 1], [], []>} : vector<8x32xbf16>, vector<32x32xbf16>, vector<8x32xf32> -> vector<8x32xf32>
    %33 = vector.extract_strided_slice %32 {offsets = [0, 0], sizes = [8, 8], strides = [1, 1]} : vector<8x32xf32> to vector<8x8xf32>
    %34 = vector.extract_strided_slice %32 {offsets = [0, 8], sizes = [8, 8], strides = [1, 1]} : vector<8x32xf32> to vector<8x8xf32>
    %35 = vector.extract_strided_slice %32 {offsets = [0, 16], sizes = [8, 8], strides = [1, 1]} : vector<8x32xf32> to vector<8x8xf32>
    %36 = vector.extract_strided_slice %32 {offsets = [0, 24], sizes = [8, 8], strides = [1, 1]} : vector<8x32xf32> to vector<8x8xf32>
    %37 = vector.shape_cast %33 : vector<8x8xf32> to vector<1x8x8xf32>
    %38 = vector.shape_cast %34 : vector<8x8xf32> to vector<1x8x8xf32>
    %39 = vector.shape_cast %35 : vector<8x8xf32> to vector<1x8x8xf32>
    %40 = vector.shape_cast %36 : vector<8x8xf32> to vector<1x8x8xf32>
    %41 = tpu.concatenate %37, %38, %39, %40 in 0 : vector<1x8x8xf32>, vector<1x8x8xf32>, vector<1x8x8xf32>, vector<1x8x8xf32> -> vector<4x8x8xf32>
    %42 = arith.truncf %41 : vector<4x8x8xf32> to vector<4x8x8xbf16>
    %c0_13 = arith.constant 0 : index
    %c0_14 = arith.constant 0 : index
    %c0_15 = arith.constant 0 : index
    %43 = vector.load %arg10[%c0_13, %c0_14, %c0_15] : memref<4x8x8xbf16, #tpu.memory_space<vmem>>, vector<4x8x8xbf16>
    "tpu.trace_start"() <{level = 10 : i32, message = "hqd,hkd->hqk"}> : () -> ()
    %cst_16 = arith.constant dense<0.000000e+00> : vector<4x8x8xf32>
    %44 = tpu.matmul %42, %43, %cst_16 {dimension_numbers = #tpu.dot_dimension_numbers<[2], [2], [1], [1], [0, 0, 0, 1, 1, 1], [0], [0]>} : vector<4x8x8xbf16>, vector<4x8x8xbf16>, vector<4x8x8xf32> -> vector<4x8x8xf32>
    "tpu.trace_stop"() : () -> ()
    %cst_17 = arith.constant dense<0xFF800000> : vector<4x8xf32>
    %45 = vector.multi_reduction <maximumf>, %44, %cst_17 [2] : vector<4x8x8xf32> to vector<4x8xf32>
    %46 = vector.shape_cast %45 : vector<4x8xf32> to vector<4x8x1xf32>
    %47 = vector.broadcast %46 : vector<4x8x1xf32> to vector<4x8x8xf32>
    %48 = arith.subf %44, %47 : vector<4x8x8xf32>
    %49 = math.exp %48 : vector<4x8x8xf32>
    %cst_18 = arith.constant dense<0.000000e+00> : vector<4x8xf32>
    %50 = vector.multi_reduction <add>, %49, %cst_18 [2] : vector<4x8x8xf32> to vector<4x8xf32>
    %51 = vector.shape_cast %50 : vector<4x8xf32> to vector<4x8x1xf32>
    %52 = arith.truncf %49 : vector<4x8x8xf32> to vector<4x8x8xbf16>
    %c0_19 = arith.constant 0 : index
    %c0_20 = arith.constant 0 : index
    %c0_21 = arith.constant 0 : index
    %53 = vector.load %arg11[%c0_19, %c0_20, %c0_21] : memref<4x8x8xbf16, #tpu.memory_space<vmem>>, vector<4x8x8xbf16>
    "tpu.trace_start"() <{level = 10 : i32, message = "hqk,hkd->hqd"}> : () -> ()
    %cst_22 = arith.constant dense<0.000000e+00> : vector<4x8x8xf32>
    %54 = tpu.matmul %52, %53, %cst_22 {dimension_numbers = #tpu.dot_dimension_numbers<[2], [1], [1], [2], [0, 0, 0, 1, 1, 2], [0], [0]>} : vector<4x8x8xbf16>, vector<4x8x8xbf16>, vector<4x8x8xf32> -> vector<4x8x8xf32>
    "tpu.trace_stop"() : () -> ()
    %55 = tpu.reciprocal %51 {approx = true} : vector<4x8x1xf32> -> vector<4x8x1xf32>
    %56 = vector.broadcast %55 : vector<4x8x1xf32> to vector<4x8x8xf32>
    %57 = arith.mulf %54, %56 : vector<4x8x8xf32>
    %58 = vector.extract_strided_slice %57 {offsets = [0, 0, 0], sizes = [1, 8, 8], strides = [1, 1, 1]} : vector<4x8x8xf32> to vector<1x8x8xf32>
    %59 = vector.shape_cast %58 : vector<1x8x8xf32> to vector<8x8xf32>
    %60 = vector.extract_strided_slice %57 {offsets = [1, 0, 0], sizes = [1, 8, 8], strides = [1, 1, 1]} : vector<4x8x8xf32> to vector<1x8x8xf32>
    %61 = vector.shape_cast %60 : vector<1x8x8xf32> to vector<8x8xf32>
    %62 = vector.extract_strided_slice %57 {offsets = [2, 0, 0], sizes = [1, 8, 8], strides = [1, 1, 1]} : vector<4x8x8xf32> to vector<1x8x8xf32>
    %63 = vector.shape_cast %62 : vector<1x8x8xf32> to vector<8x8xf32>
    %64 = vector.extract_strided_slice %57 {offsets = [3, 0, 0], sizes = [1, 8, 8], strides = [1, 1, 1]} : vector<4x8x8xf32> to vector<1x8x8xf32>
    %65 = vector.shape_cast %64 : vector<1x8x8xf32> to vector<8x8xf32>
    %66 = tpu.concatenate %59, %61, %63, %65 in 1 : vector<8x8xf32>, vector<8x8xf32>, vector<8x8xf32>, vector<8x8xf32> -> vector<8x32xf32>
    %67 = arith.truncf %66 : vector<8x32xf32> to vector<8x32xbf16>
    %c0_23 = arith.constant 0 : index
    %c0_24 = arith.constant 0 : index
    %68 = vector.load %arg7[%c0_23, %c0_24] : memref<32x32xbf16, #tpu.memory_space<vmem>>, vector<32x32xbf16>
    %cst_25 = arith.constant dense<0.000000e+00> : vector<8x32xf32>
    %69 = tpu.matmul %67, %68, %cst_25 {dimension_numbers = #tpu.dot_dimension_numbers<[1], [0], [0], [1], [0, 0, 1, 1], [], []>} : vector<8x32xbf16>, vector<32x32xbf16>, vector<8x32xf32> -> vector<8x32xf32>
    %c0_26 = arith.constant 0 : index
    %c0_27 = arith.constant 0 : index
    %70 = vector.load %arg8[%c0_26, %c0_27] : memref<1x32xf32, #tpu.memory_space<vmem>>, vector<1x32xf32>
    %71 = vector.broadcast %70 : vector<1x32xf32> to vector<8x32xf32>
    %72 = arith.addf %69, %71 : vector<8x32xf32>
    %73 = arith.addf %7, %72 : vector<8x32xf32>
    %c0_28 = arith.constant 0 : index
    %c0_29 = arith.constant 0 : index
    %c0_30 = arith.constant 0 : index
    %74 = vector.load %arg9[%c0_28, %c0_29, %c0_30] : memref<1x8x32xf32, #tpu.memory_space<vmem>>, vector<1x8x32xf32>
    %75 = vector.shape_cast %74 : vector<1x8x32xf32> to vector<8x32xf32>
    %76 = vector.shape_cast %73 : vector<8x32xf32> to vector<1x8x32xf32>
    tpu.vector_store %arg9[%c0_28, %c0_29, %c0_30], %76 {strides = array<i32>} : memref<1x8x32xf32, #tpu.memory_space<vmem>>, vector<1x8x32xf32>,
    return
  }
  func.func @transform_0(%arg0: i32, %arg1: i32) -> (i32, i32, i32) {
    %c0_i32 = arith.constant 0 : i32
    %c0_i32_0 = arith.constant 0 : i32
    %c0_i32_1 = arith.constant 0 : i32
    return %arg0, %c0_i32, %c0_i32_0 : i32, i32, i32
  }
  func.func @transform_1(%arg0: i32, %arg1: i32) -> (i32, i32) {
    %c0_i32 = arith.constant 0 : i32
    %c0_i32_0 = arith.constant 0 : i32
    %c0_i32_1 = arith.constant 0 : i32
    return %c0_i32, %c0_i32_0 : i32, i32
  }
  func.func @transform_2(%arg0: i32, %arg1: i32) -> (i32, i32) {
    %c0_i32 = arith.constant 0 : i32
    %c0_i32_0 = arith.constant 0 : i32
    %c0_i32_1 = arith.constant 0 : i32
    return %c0_i32, %c0_i32_0 : i32, i32
  }
  func.func @transform_3(%arg0: i32, %arg1: i32) -> (i32, i32) {
    %c0_i32 = arith.constant 0 : i32
    %c0_i32_0 = arith.constant 0 : i32
    %c0_i32_1 = arith.constant 0 : i32
    return %c0_i32, %c0_i32_0 : i32, i32
  }
  func.func @transform_4(%arg0: i32, %arg1: i32) -> (i32, i32) {
    %c0_i32 = arith.constant 0 : i32
    %c0_i32_0 = arith.constant 0 : i32
    %c0_i32_1 = arith.constant 0 : i32
    return %c0_i32, %c0_i32_0 : i32, i32
  }
  func.func @transform_5(%arg0: i32, %arg1: i32) -> (i32, i32) {
    %c0_i32 = arith.constant 0 : i32
    %c0_i32_0 = arith.constant 0 : i32
    %c0_i32_1 = arith.constant 0 : i32
    return %c0_i32, %c0_i32_0 : i32, i32
  }
  func.func @transform_6(%arg0: i32, %arg1: i32) -> (i32, i32) {
    %c0_i32 = arith.constant 0 : i32
    %c0_i32_0 = arith.constant 0 : i32
    %c0_i32_1 = arith.constant 0 : i32
    return %c0_i32, %c0_i32_0 : i32, i32
  }
  func.func @transform_7(%arg0: i32, %arg1: i32) -> (i32, i32, i32) {
    %c0_i32 = arith.constant 0 : i32
    %c0_i32_0 = arith.constant 0 : i32
    return %arg0, %arg1, %c0_i32 : i32, i32, i32
  }
}

</mosaic_0001>

<bundles_post_ra>
// kernel: tpu_custom_call.1
= control target key start
LH: loop header
LB: loop body
LE: loop exit
PB: predicated region body
PF: predicated region fallthrough
CT: control target
= control target key end

     0   :  { %12 = vsyncpa [#allocation5], 0  ;;  %s2064_s0 = inlined_call_operand.hbm [shape: f32[2,8,32], index: 0, kind: input, shape index: {}]   ;;  %s2065_s1 = inlined_call_operand.vmem [shape: f32[1,32], index: 1, kind: input, shape index: {}]   ;;  %s2066_s2 = inlined_call_operand.vmem [shape: f32[1,32], index: 2, kind: input, shape index: {}]   ;;  %s2067_s3 = inlined_call_operand.hbm [shape: bf16[32,32], index: 3, kind: input, shape index: {}]   ;;  %s2068_s4 = inlined_call_operand.hbm [shape: bf16[32,64], index: 4, kind: input, shape index: {}]   ;;  %s2069_s5 = inlined_call_operand.vmem [shape: bf16[32,32], index: 5, kind: input, shape index: {}]   ;;  %s2070_s6 = inlined_call_operand.vmem [shape: f32[1,32], index: 6, kind: input, shape index: {}]   ;;  %s2071_s7 = inlined_call_operand.hbm [shape: f32[2,8,32], index: 7, kind: output, shape index: {}]  }
   0x1   :  { %14 = vsyncpa [#allocation5 + $0x1], 0 }
   0x2   :  { %15 = vsyncpa [#allocation8], 0 }
   0x3   :  { %16 = vsyncpa [#allocation6], 0 }
   0x4   :  { %18 = vsyncpa [#allocation6 + $0x1], 0  ;;  %s1709_s24 = smov 0   ;;  %s1711_s25 = smov 0  }
   0x5   :  { %s1713_s26 = smov 0   ;;  %s1715_s27 = smov 0  }
   0x6   :  { %s1717_s28 = smov 0   ;;  %s1719_s29 = smov 0  }
   0x7 LB: > { %2078 = sst [smem:[#allocation14_spill]] %s1632_s24  ;;  %s1216_s30 = sadd.s32 4294967295, %s1652_s29   ;;  %s1652_s29 = sphi %s1719_s29, %s24_s29   ;;  %s1648_s28 = sphi %s1717_s28, %s2099_s28   ;;  %s1644_s27 = sphi %s1715_s27, %s2098_s27   ;;  %s1640_s26 = sphi %s1713_s26, %s2097_s26   ;;  %s1636_s25 = sphi %s1711_s25, %s2096_s25   ;;  %s1632_s24 = sphi %s1709_s24, %s2095_s24  }
   0x8   : > { %s1217_s8 = sadd.s32 4294967294, %s1652_s29   ;;  %p56_p0 = scmp.ne.s32.totalorder %s1636_s25, %s1632_s24 }
   0x9   : > { %p1743_p1 = scmp.eq.s32.totalorder %s1216_s30, 0  ;;  %p1747_p2 = scmp.eq.s32.totalorder %s1216_s30, 1 }
   0xa   : > { %p214_p3 = scmp.eq.s32.totalorder %s1217_s8, 1  ;;  %p1218_p5 = scmp.ge.s32.totalorder %s1652_s29, 1 }
   0xb   : > { %s2079_s9 = scalar_select %p1743_p1, 1, 0 }
   0xc   : > { %p1753_p4 = por %p1743_p1, %p56_p0  ;;  %p1758_p6 = por %p214_p3, %p56_p0 }
   0xd   : > { %p221_p7 = scmp.lt.s32.totalorder %s1652_s29, 3  ;;  %s1654_s14 = smov [#allocation7]  }
   0xe   : > { %s2081_s11 = scalar_select %p1753_p4, 1, 0 }
   0xf   : > { %s2082_s12 = scalar_select %p1758_p6, 1, 0 }
  0x10   : > { %p1763_p8 = pnand %p1218_p5, %p221_p7  ;;  %s239_s15 = sshll.u32 %s1654_s14, 4  ;;  %s1767_s15 = int_to_ptr.vmem [resolvable:$true] %s239_s15 }
  0x11   : > { %2083 = sst [smem:[#allocation15_spill]] %s2082_s12  ;;  %s1655_s17 = smov [#allocation9]  }
  0x12   : > { %p1372_p9 = pneg %p1763_p8  ;;  %s252_s18 = sshll.u32 %s1655_s17, 4  ;;  %s1778_s18 = int_to_ptr.vmem [resolvable:$true] %s252_s18 }
  0x13   : > { %s1480_s21 = scalar_lea.hbm %s2067_s3, 256 }
  0x14   : > { %p1774_p11 = pnand %p1372_p9, %p1743_p1  ;;  %p1481_p12 = scmp.ne.s32.totalorder %s2067_s3, %s1480_s21 }
  0x15   : > { %p1487_p5 = scmp.lt.u32.totalorder %s1480_s21, %s2067_s3 }
  0x16   : > { %p1482_p13 = pneg %p1774_p11 }
  0x18   : > { %p1483_p0 = pnand %p1482_p13, %p1481_p12 }
  0x1a   : > { %p1484_p3 = pneg %p1483_p0 }
  0x1c   : > { %p1489_p7 = pnand %p1487_p5, %p1484_p3 }
  0x1e   : > { %1492 = shalt.err (!%p1489_p7)
}
  0x1f   : > { %s1493_s14 = scalar_lea.vmem %s1767_s15, 256  ;;  %p1501_p1 = scmp.lt.s32.totalorder %s1767_s15, %s1767_s15 }
  0x20   : > { %p1494_p9 = scmp.ne.s32.totalorder %s1767_s15, %s1493_s14  ;;  %p1502_p12 = scmp.lt.s32.totalorder %s1493_s14, %s1493_s14 }
  0x22   : > { %p1496_p10 = pnand %p1494_p9, %p1482_p13  ;;  %p1503_p0 = por %p1502_p12, %p1501_p1 }
  0x24   : > { %p1497_p6 = pneg %p1496_p10 }
  0x26   : > { %p1504_p4 = pnand %p1503_p0, %p1497_p6 }
  0x28   : > { %1507 = shalt.err (!%p1504_p4)
}
  0x29   : > { %s1656_s17 = smov 64   ;;  %s1657_s19 = smov 4  }
  0x2a   : > { %1375 = dma.hbm_to_vmem [thread:$0]  (!%p1774_p11), %s2067_s3, 256, %s1767_s15, [#allocation8], %s1656_s17, %s1656_s17, %s1657_s19  }
  0x2b   : > { %s1508_s30 = scalar_lea.hbm %s2068_s4, 256 }
  0x2c   : > { %p1509_p1 = scmp.ne.s32.totalorder %s2068_s4, %s1508_s30  ;;  %p1515_p10 = scmp.lt.u32.totalorder %s1508_s30, %s2068_s4 }
  0x2e   : > { %p1511_p4 = pnand %p1509_p1, %p1482_p13 }
  0x30   : > { %p1512_p6 = pneg %p1511_p4 }
  0x32   : > { %p1517_p3 = pnand %p1515_p10, %p1512_p6 }
  0x34   : > { %1520 = shalt.err (!%p1517_p3)
}
  0x35   : > { %s1521_s15 = scalar_lea.vmem %s1778_s18, 256  ;;  %p1529_p12 = scmp.lt.s32.totalorder %s1778_s18, %s1778_s18 }
  0x36   : > { %p1522_p5 = scmp.ne.s32.totalorder %s1778_s18, %s1521_s15  ;;  %p1530_p0 = scmp.lt.s32.totalorder %s1521_s15, %s1521_s15 }
  0x38   : > { %p1524_p7 = pnand %p1522_p5, %p1482_p13  ;;  %p1531_p1 = por %p1530_p0, %p1529_p12 }
  0x3a   : > { %p1525_p9 = pneg %p1524_p7 }
  0x3c   : > { %p1532_p4 = pnand %p1531_p1, %p1525_p9 }
  0x3e   : > { %1535 = shalt.err (!%p1532_p4)
}
  0x3f   : > { %1378 = dma.hbm_to_vmem [thread:$0]  (!%p1774_p11), %s2068_s4, 256, %s1778_s18, [#allocation8], %s1656_s17, %s1656_s17, %s1657_s19  }
  0x40   : > { %s36_s20 = sadd.s32 1, %s1648_s28  ;;  %s43_s21 = sadd.s32 1, %s1640_s26 }
  0x41   : > { %p38_p13 = scmp.ge.s32.totalorder %s36_s20, 2  ;;  %p50_p6 = scmp.ne.s32.totalorder %s1640_s26, %s1636_s25 }
  0x42   : > { %p51_p10 = scmp.eq.s32.totalorder %s1652_s29, 0  ;;  %p1389_p3 = scmp.lt.s32.totalorder %s1652_s29, 2 }
  0x43   : > { %s2101_s20 = smov (%p38_p13, %s36_s20), 0  ;;  %p1842_p7 = por %p1747_p2, %p50_p6 }
  0x44   : > { %p52_p5 = por %p51_p10, %p50_p6  ;;  %s40_s22 = ssub.s32 %s1648_s28, %s2101_s20 }
  0x45   : > { %s2086_s16 = scalar_select %p1842_p7, 1, 0 }
  0x46   : > { %s272_s23 = sand.u32 1, %s1640_s26   ;;  %p41_p9 = scmp.eq.s32.totalorder %s40_s22, 0 }
  0x47   : > { %s1222_s18 = sshll.u32 %s272_s23, 3  ;;  %s1223_s17 = sshll.u32 %s1648_s28, 7 }
  0x48   : > { %s1851_s19 = scalar_select %p41_p9, %s1640_s26, %s43_s21  }
  0x49   : > { %s1856_s14 = scalar_lea.hbm %s2064_s0, %s1223_s17  ;;  %s276_s10 = scalar_lea.vmem [#allocation4], %s1222_s18 }
  0x4a   : > { %s283_s15 = sshll.u32 %s276_s10, 4  ;;  %p1860_p2 = pnand %p1389_p3, %p52_p5  ;;  %s1864_s15 = int_to_ptr.vmem [resolvable:$true] %s283_s15 }
  0x4b   : > { %s273_s12 = scalar_lea.sflag [#allocation5], %s272_s23  ;;  %s1536_s21 = scalar_lea.hbm %s1856_s14, 128 }
  0x4c   : > { %p1537_p11 = scmp.ne.s32.totalorder %s1856_s14, %s1536_s21  ;;  %p1538_p12 = pneg %p1860_p2 }
  0x4d   : > { %s1541_s17 = scalar_lea.hbm %s2064_s0, 256  ;;  %p1542_p4 = scmp.lt.u32.totalorder %s1856_s14, %s2064_s0 }
  0x4e   : > { %p1539_p0 = pnand %p1538_p12, %p1537_p11  ;;  %p1543_p13 = scmp.lt.u32.totalorder %s1541_s17, %s1536_s21 }
  0x4f   : > { %p1545_p10 = scmp.lt.u32.totalorder %s1536_s21, %s1856_s14 }
  0x50   : > { %p1540_p1 = pneg %p1539_p0  ;;  %p1544_p6 = por %p1543_p13, %p1542_p4 }
  0x52   : > { %p1546_p3 = por %p1545_p10, %p1544_p6 }
  0x54   : > { %p1547_p5 = pnand %p1546_p3, %p1540_p1 }
  0x56   : > { %1550 = shalt.err (!%p1547_p5)
}
  0x57   : > { %s1551_s23 = scalar_lea.vmem %s1864_s15, 128  ;;  %s1658_s10 = smov [#allocation4]  }
  0x58   : > { %p1552_p9 = scmp.ne.s32.totalorder %s1864_s15, %s1551_s23  ;;  %s1556_s22 = sshll.u32 %s1658_s10, 4  ;;  %s1557_s22 = int_to_ptr.vmem [resolvable:$false] %s1556_s22 }
  0x59   : > { %s1558_s18 = scalar_lea.vmem %s1557_s22, 256  ;;  %p1559_p7 = scmp.lt.s32.totalorder %s1864_s15, %s1557_s22 }
  0x5a   : > { %p1554_p11 = pnand %p1552_p9, %p1538_p12  ;;  %p1560_p4 = scmp.lt.s32.totalorder %s1558_s18, %s1551_s23 }
  0x5c   : > { %p1555_p0 = pneg %p1554_p11  ;;  %p1561_p13 = por %p1560_p4, %p1559_p7 }
  0x5e   : > { %p1562_p6 = pnand %p1561_p13, %p1555_p0 }
  0x60   : > { %1565 = shalt.err (!%p1562_p6)
}
  0x61   : > { %1382 = dma.hbm_to_vmem [thread:$0]  (!%p1860_p2), %s1856_s14, 128, %s1864_s15, %s273_s12  }
  0x62   : > { %292 = sbr.rel (%p1763_p8) target bundleno = 1723 (0x6bb), region = 48  ;;  %s1894_s21 = sand.u32 (!%p1763_p8), 1, %s1636_s25  }
  0x63   : > { %s1225_s17 = sshll.u32 (!%p1763_p8), %s1894_s21, 3  ;;  %s295_s30 = scalar_lea.sflag (!%p1763_p8), [#allocation5], %s1894_s21 }
  0x64   : > { %s298_s8 = scalar_lea.vmem (!%p1763_p8), [#allocation4], %s1225_s17  ;;  %p2088_p7 = scmp.ne.s32.totalorder (!%p1763_p8), %s2081_s11, 0 }
  0x69   : > { %1619 = dma.done.wait (%p2088_p7), %s295_s30, 128  }
  0x6a   : > { %1621 = vsyncadd (%p2088_p7), %s295_s30, 4294967168  ;;  %p2089_p2 = scmp.ne.s32.totalorder %s2079_s9, 0 }
  0x6c   : > { %1623 = dma.done.wait (%p2089_p2), [#allocation8], 512  }
  0x6d   : > { %1625 = vsyncadd (%p2089_p2), [#allocation8], 4294966784  ;;  %vm343_vm0 = vcmask 261120   ;;  %v1908_v0 = vld [vmem:[%s298_s8] sm:$0xff]  ;;  %v1456_v13 = vld [vmem:[#allocation7] sm:$0xff]   ;;  %v1659_v14 = vmov 0.0  }
  0x6e   : > { %v344_v1 = vsel %vm343_vm0, %v1908_v0, 0.0  ;;  %v1454_v12 = vld [vmem:[#allocation9] sm:$0xff]   ;;  %1288 = vmatprep.subr.bf16.mxu0 %v1659_v14  ;;  %1296 = vmatprep.subr.bf16.mxu1 %v1659_v14  ;;  %v1455_v15 = vld [vmem:[#allocation9 + $0x8] sm:$0xff]   ;;  %vm1660_vm1 = vmmov 0   ;;  %v1457_v16 = vld [vmem:[#allocation7 + $0x8] sm:$0xff]   ;;  %vm448_vm2 = vcmask 60416  }
  0x6f   : > { %345 = vadd.xlane.f32.xlu0 %v344_v1  ;;  %1289 = vmatpush3.bf16.msra.mxu0 %v1454_v12  ;;  %v1229_v24 = vld [vmem:[%s2065_s1] ss:$0 sm:$0xff]  ;;  %s1661_s15 = smov 120   ;;  %s1662_s24 = smov 112   ;;  %vm593_vm3 = vcmask 64512   ;;  %vm825_vm4 = vcmask 1043456  }
  0x70   : > { %1297 = vmatpush3.bf16.msra.mxu1 %v1456_v13  ;;  %1290 = vmatprep.subr.bf16.mxu0 %v1659_v14  ;;  %v1230_v26 = vld [vmem:[%s2066_s2] ss:$0 sm:$0xff]  ;;  %s1663_s12 = smov 104   ;;  %s1664_s23 = smov 96   ;;  %vm1028_vm5 = vcmask 130048   ;;  %vm1030_vm6 = vcmask 195584  }
  0x71   : > { %1292 = vmatprep.mubr.msk.bf16.mxu0 %vm1660_vm1, %v1659_v14  ;;  %1298 = vmatprep.subr.bf16.mxu1 %v1659_v14  ;;  %s1665_s10 = smov 8   ;;  %s1666_s9 = smov 16  }
  0x72   : > { %1300 = vmatprep.mubr.msk.bf16.mxu1 %vm1660_vm1, %v1659_v14  ;;  %s1667_s11 = smov 24   ;;  %p2090_p12 = scmp.ne.s32.totalorder %s2086_s16, 0 }
  0x73   : > { %486 = vadd.xlane.f32.xlu0 %v344_v1  ;;  %1291 = vmatpush3.bf16.msra.mxu0 %v1455_v15  ;;  %s1668_s18 = smov [#allocation10]  }
  0x74   : > { %1304 = vmatprep.subr.bf16.mxu0 %v1659_v14  ;;  %1299 = vmatpush3.bf16.msra.mxu1 %v1457_v16  ;;  %s1570_s30 = sshll.u32 %s1668_s18, 4  ;;  %s1571_s30 = int_to_ptr.vmem [resolvable:$false] %s1570_s30 }
  0x75   : > { %1310 = vmatprep.subr.bf16.mxu1 %v1659_v14  ;;  %s1572_s8 = scalar_lea.vmem %s1571_s30, 256 }
  0xfc   : > { %v346_v2 = vpop.xlane.xlu0 %345 }
  0xfd   : > { %v348_v3 = vmul.f32 0.03125, %v346_v2 }
  0xff   : > { %v349_v4 = vsub.f32 %v1908_v0, %v348_v3 }
 0x100   : > { %v487_v5 = vpop.xlane.xlu0 %486 }
 0x101   : > { %v489_v6 = vmul.f32 0.03125, %v487_v5  ;;  %v350_v7 = vmul.f32 %v349_v4, %v349_v4 }
 0x103   : > { %v490_v8 = vsub.f32 %v1908_v0, %v489_v6  ;;  %v351_v9 = vsel %vm343_vm0, %v350_v7, 0.0 }
 0x104   : > { %352 = vadd.xlane.f32.xlu1 %v351_v9 }
 0x105   : > { %v491_v10 = vmul.f32 %v490_v8, %v490_v8 }
 0x107   : > { %v492_v11 = vsel %vm343_vm0, %v491_v10, 0.0 }
 0x108   : > { %493 = vadd.xlane.f32.xlu1 %v492_v11 }
 0x191   : > { %v353_v17 = vpop.xlane.xlu1 %352 }
 0x192   : > { %v354_v18 = vmul.f32 0.03125, %v353_v17 }
 0x194   : > { %v355_v19 = vadd.f32 1e-05, %v354_v18 }
 0x195   : > { %v494_v20 = vpop.xlane.xlu1 %493 }
 0x196   : > { %1460 = vrsqrt.f32 %v355_v19  ;;  %v495_v21 = vmul.f32 0.03125, %v494_v20 }
 0x198   : > { %v496_v22 = vadd.f32 1e-05, %v495_v21 }
 0x19a   : > { %1462 = vrsqrt.f32 %v496_v22 }
 0x1a0   : > { %v1461_v23 = vpop.eup %1460 }
 0x1a1   : > { %v357_v25 = vmul.f32 %v1461_v23, %v349_v4 }
 0x1a3   : > { %v365_v27 = vmul.f32 %v1229_v24, %v357_v25 }
 0x1a4   : > { %v1463_v28 = vpop.eup %1462 }
 0x1a5   : > { %v373_v29 = vadd.f32 %v1230_v26, %v365_v27  ;;  %v498_v30 = vmul.f32 %v1463_v28, %v490_v8 }
 0x1a7   : > { %v374_v31 = vpack.c.bf16 %v373_v29, %v373_v29  ;;  %v506_v32 = vmul.f32 %v1229_v24, %v498_v30 }
 0x1a9   : > { %1293 = vmatmul.mubr.msk.bf16.vlgmr.msra.gmra.mrb[0].mxu0 %vm343_vm0, %v374_v31  ;;  %v514_v33 = vadd.f32 %v1230_v26, %v506_v32 }
 0x1aa   : > { %1306 = vmatprep.mubr.msk.bf16.mxu0 %vm1660_vm1, %v1659_v14 }
 0x1ab   : > { %v515_v34 = vpack.c.bf16 %v514_v33, %v514_v33 }
 0x1ad   : > { %1301 = vmatmul.mubr.msk.bf16.vlgmr.msra.gmra.mrb[0].mxu1 %vm343_vm0, %v515_v34 }
 0x1ae   : > { %1312 = vmatprep.mubr.msk.bf16.mxu1 %vm1660_vm1, %v1659_v14 }
 0x27c   : > { %v428_v35 = vpop.f32.mrb[0].mxu0 }
 0x27d   : > { %v1938_v36 = vpack.c.bf16 %v428_v35, %v428_v35  ;;  %435 = vrot.lane.b32.xlu0 %v428_v35, %s1661_s15  ;;  %v1294_v37 = vpop.f32.mrb[1].mxu0  ;;  %438 = vrot.lane.b32.xlu1 %v428_v35, %s1662_s24 }
 0x27e   : > { %v431_v38 = vpop.f32.mrb[2].mxu0 }
 0x27f   : > { %449 = vst.msk [vmem:[#allocation2] sm:$0xf] %vm448_vm2, %v1938_v36  ;;  %v1295_v39 = vpop.f32.mrb[3].mxu0 }
 0x280   : > { %v569_v40 = vpop.f32.mrb[0].mxu1 }
 0x281   : > { %441 = vrot.lane.b32.xlu1 %v428_v35, %s1663_s12  ;;  %579 = vrot.lane.b32.xlu0 %v569_v40, %s1662_s24  ;;  %v1302_v41 = vpop.f32.mrb[1].mxu1  ;;  %v585_v46 = vpack.c.bf16 %v569_v40, %v569_v40  ;;  %s336_s24 = scalar_lea.vmem [#allocation10], %s1225_s17 }
 0x282   : > { %v572_v42 = vpop.f32.mrb[2].mxu1 }
 0x283   : > { %v1303_v43 = vpop.f32.mrb[3].mxu1 }
 0x285   : > { %576 = vrot.lane.b32.xlu1 %v569_v40, %s1661_s15  ;;  %s1256_s15 = sshll.u32 %s1644_s27, 7  ;;  %s1102_s27 = scalar_lea.sflag [#allocation6], %s1894_s21 }
 0x286   : > { %v589_v44 = vld [vmem:[#allocation2] sm:$0xf]  ;;  %s2014_s22 = scalar_lea.hbm %s2071_s7, %s1256_s15 }
 0x287   : > { %v598_v45 = vsel %vm593_vm3, %v589_v44, 0 }
 0x288   : > { %1305 = vmatpush3.bf16.xpose.msra.mxu0 %v598_v45 }
 0x289   : > { %582 = vrot.lane.b32.xlu1 %v569_v40, %s1663_s12  ;;  %1316 = vmatprep.subr.bf16.mxu0 %v1659_v14  ;;  %s1116_s12 = sshll.u32 %s336_s24, 4  ;;  %s2016_s12 = int_to_ptr.vmem [resolvable:$true] %s1116_s12 }
 0x28a   : > { %s1566_s17 = scalar_lea.vmem %s2016_s12, 128  ;;  %p1573_p3 = scmp.lt.s32.totalorder %s2016_s12, %s1571_s30 }
 0x28b   : > { %p1567_p8 = scmp.ne.s32.totalorder %s2016_s12, %s1566_s17  ;;  %p1574_p5 = scmp.lt.s32.totalorder %s1572_s8, %s1566_s17 }
 0x28d   : > { %p1568_p1 = pnand %p1567_p8, %p2090_p12  ;;  %p1575_p9 = por %p1574_p5, %p1573_p3 }
 0x28f   : > { %1307 = vmatmul.mubr.msk.bf16.vlgmr.msra.gmra.mrb[4].mxu0 %vm593_vm3, %v585_v46  ;;  %p1569_p10 = pneg %p1568_p1 }
 0x290   : > { %1318 = vmatprep.mubr.msk.bf16.mxu0 %vm1660_vm1, %v1659_v14 }
 0x291   : > { %p1576_p11 = pnand %p1575_p9, %p1569_p10 }
 0x2ef   : > { %v439_v47 = vpop.permute.xlu1 %438  ;;  %v436_v48 = vpop.permute.xlu0 %435 }
 0x2f0   : > { %v446_v49 = vpack.c.bf16 %v439_v47, %v439_v47  ;;  %v445_v50 = vpack.c.bf16 %v436_v48, %v436_v48 }
 0x2f2   : > { %451 = vst.msk [vmem:[#allocation2 + $0x8] sm:$0xf] %vm448_vm2, %v446_v49  ;;  %450 = vst.msk [vmem:[#allocation2 + $0x4] sm:$0xf] %vm448_vm2, %v445_v50 }
 0x2f3   : > { %v442_v51 = vpop.permute.xlu1 %441  ;;  %v580_v57 = vpop.permute.xlu0 %579 }
 0x2f4   : > { %v447_v52 = vpack.c.bf16 %v442_v51, %v442_v51  ;;  %v587_v60 = vpack.c.bf16 %v580_v57, %v580_v57 }
 0x2f6   : > { %452 = vst.msk [vmem:[#allocation2 + $0xc] sm:$0xf] %vm448_vm2, %v447_v52 }
 0x2f7   : > { %v577_v58 = vpop.permute.xlu1 %576 }
 0x2f8   : > { %v586_v61 = vpack.c.bf16 %v577_v58, %v577_v58 }
 0x2f9   : > { %v591_v53 = vld [vmem:[#allocation2 + $0x8] sm:$0xf]  ;;  %v590_v54 = vld [vmem:[#allocation2 + $0x4] sm:$0xf] }
 0x2fa   : > { %v690_v55 = vsel %vm593_vm3, %v591_v53, 0  ;;  %v644_v56 = vsel %vm593_vm3, %v590_v54, 0 }
 0x2fb   : > { %1317 = vmatpush3.bf16.xpose.msra.mxu0 %v690_v55  ;;  %1311 = vmatpush3.bf16.xpose.msra.mxu1 %v644_v56  ;;  %v583_v63 = vpop.permute.xlu1 %582 }
 0x2fc   : > { %1322 = vmatprep.subr.bf16.mxu1 %v1659_v14  ;;  %1328 = vmatprep.subr.bf16.mxu0 %v1659_v14  ;;  %v588_v1 = vpack.c.bf16 %v583_v63, %v583_v63 }
 0x2fd   : > { %v592_v59 = vld [vmem:[#allocation2 + $0xc] sm:$0xf] }
 0x2fe   : > { %v736_v62 = vsel %vm593_vm3, %v592_v59, 0 }
 0x302   : > { %1313 = vmatmul.mubr.msk.bf16.vlgmr.msra.gmra.mrb[4].mxu1 %vm593_vm3, %v586_v61  ;;  %1319 = vmatmul.mubr.msk.bf16.vlgmr.msra.gmra.mrb[8].mxu0 %vm593_vm3, %v587_v60 }
 0x303   : > { %1323 = vmatpush3.bf16.xpose.msra.mxu1 %v736_v62  ;;  %1324 = vmatprep.mubr.msk.bf16.mxu1 %vm1660_vm1, %v1659_v14 }
 0x304   : > { %1334 = vmatprep.subr.bf16.mxu1 %v1659_v14  ;;  %1330 = vmatprep.mubr.msk.bf16.mxu0 %vm1660_vm1, %v1659_v14 }
 0x30a   : > { %1325 = vmatmul.mubr.msk.bf16.vlgmr.msra.gmra.mrb[8].mxu1 %vm593_vm3, %v588_v1 }
 0x30b   : > { %1336 = vmatprep.mubr.msk.bf16.mxu1 %vm1660_vm1, %v1659_v14 }
 0x362   : > { %v634_v2 = vpop.f32.mrb[4].mxu0 }
 0x363   : > { %v1308_v3 = vpop.f32.mrb[5].mxu0  ;;  %v778_v4 = vsel %vm593_vm3, %v634_v2, -inf }
 0x364   : > { %779 = vmax.xlane.f32.xlu0 %v778_v4  ;;  %v637_v5 = vpop.f32.mrb[6].mxu0  ;;  %v1458_v4 = vld [vmem:[%s2069_s5] sm:$0xff]  }
 0x365   : > { %v1309_v6 = vpop.f32.mrb[7].mxu0 }
 0x3d5   : > { %v680_v7 = vpop.f32.mrb[4].mxu1  ;;  %v726_v8 = vpop.f32.mrb[8].mxu0 }
 0x3d6   : > { %v1314_v9 = vpop.f32.mrb[5].mxu1  ;;  %v1320_v10 = vpop.f32.mrb[9].mxu0  ;;  %v781_v11 = vsel %vm593_vm3, %v680_v7, -inf  ;;  %v784_v12 = vsel %vm593_vm3, %v726_v8, -inf }
 0x3d7   : > { %782 = vmax.xlane.f32.xlu1 %v781_v11  ;;  %v683_v13 = vpop.f32.mrb[6].mxu1  ;;  %785 = vmax.xlane.f32.xlu0 %v784_v12  ;;  %v729_v15 = vpop.f32.mrb[10].mxu0  ;;  %v1459_v9 = vld [vmem:[%s2069_s5 + $0x8] sm:$0xff]  }
 0x3d8   : > { %v1315_v16 = vpop.f32.mrb[7].mxu1  ;;  %v1321_v17 = vpop.f32.mrb[11].mxu0 }
 0x3dd   : > { %v772_v18 = vpop.f32.mrb[8].mxu1 }
 0x3de   : > { %v1326_v19 = vpop.f32.mrb[9].mxu1  ;;  %v787_v20 = vsel %vm593_vm3, %v772_v18, -inf }
 0x3df   : > { %v775_v21 = vpop.f32.mrb[10].mxu1  ;;  %788 = vmax.xlane.f32.xlu0 %v787_v20 }
 0x3e0   : > { %v1327_v22 = vpop.f32.mrb[11].mxu1 }
 0x3e8   : > { %467 = vrot.lane.b32.xlu1 %v445_v50, %s1664_s23 }
 0x3ec   : > { %469 = vrot.lane.b32.xlu1 %v446_v49, %s1664_s23 }
 0x3f0   : > { %471 = vrot.lane.b32.xlu1 %v447_v52, %s1664_s23 }
 0x3f1   : > { %v780_v23 = vpop.xlane.xlu0 %779 }
 0x3f2   : > { %v790_v28 = vsub.f32 %v634_v2, %v780_v23 }
 0x3f4   : > { %v794_v32 = vmul.f32 1.442695, %v790_v28 }
 0x3f5   : > { %465 = vrot.lane.b32.xlu0 %v1938_v36, %s1664_s23 }
 0x464   : > { %v783_v24 = vpop.xlane.xlu1 %782  ;;  %v786_v25 = vpop.xlane.xlu0 %785 }
 0x465   : > { %v791_v26 = vsub.f32 %v680_v7, %v783_v24  ;;  %v792_v27 = vsub.f32 %v726_v8, %v786_v25 }
 0x467   : > { %v796_v29 = vmul.f32 1.442695, %v791_v26  ;;  %v798_v30 = vmul.f32 1.442695, %v792_v27 }
 0x468   : > { %v468_v31 = vpop.permute.xlu1 %467 }
 0x469   : > { %1464 = vpow2.f32 %v796_v29  ;;  %478 = vst.msk [vmem:[#allocation3 + $0x4] sm:$0xf] %vm448_vm2, %v468_v31 }
 0x46a   : > { %1466 = vpow2.f32 %v798_v30 }
 0x46b   : > { %1468 = vpow2.f32 %v794_v32 }
 0x46c   : > { %v470_v33 = vpop.permute.xlu1 %469  ;;  %v789_v34 = vpop.xlane.xlu0 %788 }
 0x46d   : > { %479 = vst.msk [vmem:[#allocation3 + $0x8] sm:$0xf] %vm448_vm2, %v470_v33  ;;  %v793_v35 = vsub.f32 %v772_v18, %v789_v34  ;;  %v1251_v33 = vld [vmem:[%s2070_s6] ss:$0 sm:$0xff] }
 0x46f   : > { %v800_v36 = vmul.f32 1.442695, %v793_v35 }
 0x470   : > { %v472_v37 = vpop.permute.xlu1 %471  ;;  %v466_v38 = vpop.permute.xlu0 %465  ;;  %v819_v39 = vld [vmem:[#allocation3 + $0x4] sm:$0xf] }
 0x471   : > { %1470 = vpow2.f32 %v800_v36  ;;  %480 = vst.msk [vmem:[#allocation3 + $0xc] sm:$0xf] %vm448_vm2, %v472_v37  ;;  %477 = vst.msk [vmem:[#allocation3] sm:$0xf] %vm448_vm2, %v466_v38  ;;  %v873_v40 = vsel %vm825_vm4, %v819_v39, 0 }
 0x472   : > { %1335 = vmatpush3.bf16.msra.mxu1 %v873_v40 }
 0x473   : > { %v1465_v41 = vpop.eup %1464  ;;  %1346 = vmatprep.subr.bf16.mxu1 %v1659_v14 }
 0x474   : > { %v1467_v42 = vpop.eup %1466  ;;  %v805_v43 = vsel %vm593_vm3, %v1465_v41, 0.0  ;;  %v815_v44 = vpack.c.bf16 %v1465_v41, %v1465_v41  ;;  %v820_v51 = vld [vmem:[#allocation3 + $0x8] sm:$0xf] }
 0x475   : > { %806 = vadd.xlane.f32.xlu0 %v805_v43  ;;  %v808_v45 = vsel %vm593_vm3, %v1467_v42, 0.0  ;;  %v1469_v46 = vpop.eup %1468  ;;  %v919_v56 = vsel %vm825_vm4, %v820_v51, 0  ;;  %v816_v58 = vpack.c.bf16 %v1467_v42, %v1467_v42 }
 0x476   : > { %809 = vadd.xlane.f32.xlu1 %v808_v45  ;;  %1337 = vmatmul.mubr.msk.bf16.vlgmr.msra.gmra.mrb[12].mxu1 %vm593_vm3, %v815_v44  ;;  %v814_v53 = vpack.c.bf16 %v1469_v46, %v1469_v46  ;;  %v802_v57 = vsel %vm593_vm3, %v1469_v46, 0.0 }
 0x477   : > { %1348 = vmatprep.mubr.msk.bf16.mxu1 %vm1660_vm1, %v1659_v14 }
 0x478   : > { %v818_v47 = vld [vmem:[#allocation3] sm:$0xf]  ;;  %v821_v48 = vld [vmem:[#allocation3 + $0xc] sm:$0xf] }
 0x479   : > { %v827_v49 = vsel %vm825_vm4, %v818_v47, 0  ;;  %v965_v50 = vsel %vm825_vm4, %v821_v48, 0 }
 0x47a   : > { %1329 = vmatpush3.bf16.msra.mxu0 %v827_v49  ;;  %1347 = vmatpush3.bf16.msra.mxu1 %v965_v50 }
 0x47b   : > { %v1471_v52 = vpop.eup %1470  ;;  %1340 = vmatprep.subr.bf16.mxu0 %v1659_v14 }
 0x47c   : > { %v811_v54 = vsel %vm593_vm3, %v1471_v52, 0.0  ;;  %v817_v55 = vpack.c.bf16 %v1471_v52, %v1471_v52 }
 0x47d   : > { %812 = vadd.xlane.f32.xlu0 %v811_v54  ;;  %1331 = vmatmul.mubr.msk.bf16.vlgmr.msra.gmra.mrb[12].mxu0 %vm593_vm3, %v814_v53 }
 0x47e   : > { %1341 = vmatpush3.bf16.msra.mxu0 %v919_v56  ;;  %1349 = vmatmul.mubr.msk.bf16.vlgmr.msra.gmra.mrb[16].mxu1 %vm593_vm3, %v817_v55 }
 0x47f   : > { %1342 = vmatprep.mubr.msk.bf16.mxu0 %vm1660_vm1, %v1659_v14  ;;  %1352 = vmatprep.subr.bf16.mxu0 %v1659_v14 }
 0x481   : > { %803 = vadd.xlane.f32.xlu0 %v802_v57 }
 0x485   : > { %1343 = vmatmul.mubr.msk.bf16.vlgmr.msra.gmra.mrb[16].mxu0 %vm593_vm3, %v816_v58 }
 0x486   : > { %1356 = vmatprep.mubr.msk.bf16.mxu0 %vm1660_vm1, %v1659_v14  ;;  %1353 = vmatpush3.bf16.msra.mxu0 %v1458_v4 }
 0x487   : > { %1354 = vmatprep.subr.bf16.mxu0 %v1659_v14 }
 0x48a   : > { %1355 = vmatpush3.bf16.msra.mxu0 %v1459_v9 }
 0x502   : > { %v807_v59 = vpop.xlane.xlu0 %806 }
 0x503   : > { %1472 = vrcp.f32 %v807_v59  ;;  %v810_v1 = vpop.xlane.xlu1 %809 }
 0x504   : > { %1474 = vrcp.f32 %v810_v1 }
 0x50a   : > { %v813_v5 = vpop.xlane.xlu0 %812 }
 0x50b   : > { %1476 = vrcp.f32 %v813_v5 }
 0x50d   : > { %v1473_v60 = vpop.eup %1472 }
 0x50e   : > { %v1475_v16 = vpop.eup %1474  ;;  %v804_v23 = vpop.xlane.xlu0 %803 }
 0x50f   : > { %1478 = vrcp.f32 %v804_v23 }
 0x515   : > { %v1477_v21 = vpop.eup %1476 }
 0x519   : > { %v1479_v24 = vpop.eup %1478 }
 0x549   : > { %v909_v61 = vpop.f32.mrb[12].mxu1 }
 0x54a   : > { %v1012_v62 = vmul.f32 %v1473_v60, %v909_v61  ;;  %v1338_v63 = vpop.f32.mrb[13].mxu1 }
 0x54b   : > { %v912_v2 = vpop.f32.mrb[14].mxu1 }
 0x54c   : > { %v1339_v3 = vpop.f32.mrb[15].mxu1  ;;  %1016 = vrot.lane.b32.xlu0 %v1012_v62, %s1665_s10 }
 0x550   : > { %v863_v6 = vpop.f32.mrb[12].mxu0 }
 0x551   : > { %v1332_v7 = vpop.f32.mrb[13].mxu0  ;;  %v1001_v8 = vpop.f32.mrb[16].mxu1  ;;  %v1011_v27 = vmul.f32 %v1479_v24, %v863_v6 }
 0x552   : > { %v866_v10 = vpop.f32.mrb[14].mxu0  ;;  %v1350_v11 = vpop.f32.mrb[17].mxu1  ;;  %v1014_v22 = vmul.f32 %v1477_v21, %v1001_v8 }
 0x553   : > { %v1333_v12 = vpop.f32.mrb[15].mxu0  ;;  %v1004_v13 = vpop.f32.mrb[18].mxu1 }
 0x554   : > { %v1351_v15 = vpop.f32.mrb[19].mxu1 }
 0x558   : > { %v955_v17 = vpop.f32.mrb[16].mxu0 }
 0x559   : > { %v1013_v18 = vmul.f32 %v1475_v16, %v955_v17  ;;  %v1344_v19 = vpop.f32.mrb[17].mxu0 }
 0x55a   : > { %v958_v20 = vpop.f32.mrb[18].mxu0 }
 0x55b   : > { %1020 = vrot.lane.b32.xlu1 %v1013_v18, %s1666_s9  ;;  %v1345_v14 = vpop.f32.mrb[19].mxu0 }
 0x55f   : > { %1024 = vrot.lane.b32.xlu1 %v1014_v22, %s1667_s11 }
 0x5be   : > { %v1017_v25 = vpop.permute.xlu0 %1016 }
 0x5bf   : > { %v1027_v28 = vsel %vm593_vm3, %v1011_v27, %v1017_v25 }
 0x5cd   : > { %v1021_v26 = vpop.permute.xlu1 %1020 }
 0x5ce   : > { %v1029_v29 = vsel %vm1028_vm5, %v1027_v28, %v1021_v26 }
 0x5d1   : > { %v1025_v30 = vpop.permute.xlu1 %1024 }
 0x5d2   : > { %v1031_v31 = vsel %vm1030_vm6, %v1029_v29, %v1025_v30 }
 0x5d3   : > { %v1032_v32 = vpack.c.bf16 %v1031_v31, %v1031_v31 }
 0x5d5   : > { %1357 = vmatmul.mubr.msk.bf16.vlgmr.msra.gmra.mrb[20].mxu0 %vm343_vm0, %v1032_v32 }
 0x6a8   : > { %v1093_v34 = vpop.f32.mrb[20].mxu0 }
 0x6a9   : > { %v1094_v35 = vadd.f32 %v1251_v33, %v1093_v34  ;;  %v1358_v36 = vpop.f32.mrb[21].mxu0 }
 0x6aa   : > { %v1096_v37 = vpop.f32.mrb[22].mxu0 }
 0x6ab   : > { %v1099_v38 = vadd.f32 %v1094_v35, %v1908_v0  ;;  %v1359_v39 = vpop.f32.mrb[23].mxu0 }
 0x6ad   : > { %1100 = vst.msk [vmem:[%s336_s24] sm:$0xff] %vm343_vm0, %v1099_v38 }
 0x6ae   : > { %1579 = shalt.err (!%p1576_p11)
}
 0x6af   : > { %s1580_s21 = scalar_lea.hbm %s2014_s22, 128  ;;  %s1584_s13 = scalar_lea.hbm %s2071_s7, 256 }
 0x6b0   : > { %p1581_p0 = scmp.ne.s32.totalorder %s2014_s22, %s1580_s21  ;;  %p1585_p6 = scmp.lt.u32.totalorder %s2014_s22, %s2071_s7 }
 0x6b1   : > { %p1586_p7 = scmp.lt.u32.totalorder %s1584_s13, %s1580_s21  ;;  %p1588_p8 = scmp.lt.u32.totalorder %s1580_s21, %s2014_s22 }
 0x6b2   : > { %p1582_p4 = pnand %p1581_p0, %p2090_p12 }
 0x6b3   : > { %p1587_p2 = por %p1586_p7, %p1585_p6 }
 0x6b4   : > { %p1583_p13 = pneg %p1582_p4 }
 0x6b5   : > { %p1589_p1 = por %p1588_p8, %p1587_p2 }
 0x6b7   : > { %p1590_p10 = pnand %p1589_p1, %p1583_p13 }
 0x6b9   : > { %1593 = shalt.err (!%p1590_p10)
}
 0x6ba   : > { %1370 = dma.vmem_to_hbm [thread:$0]  (%p2090_p12), %s2016_s12, 128, %s2014_s22, %s1102_s27  }
 0x6bb PF: > { %s2091_s24 = sld [smem:[#allocation14_spill]]  ;;  %s2092_s23 = sld [smem:[#allocation15_spill]] }
 0x6bc   : > { %p2094_p5 = scmp.ge.s32.totalorder %s1652_s29, 2 }
 0x6c1   : > { %s1128_s10 = sand.u32 1, %s2091_s24   ;;  %p2093_p3 = scmp.ne.s32.totalorder %s2092_s23, 0 }
 0x6c2   : > { %s1129_s17 = scalar_lea.sflag [#allocation6], %s1128_s10 }
 0x6c3   : > { %p1384_p9 = pnand %p2094_p5, %p2093_p3 }
 0x6c5   : > { %1627 = dma.done.wait (!%p1384_p9), %s1129_s17, 128  }
 0x6c6   : > { %1629 = vsyncadd (!%p1384_p9), %s1129_s17, 4294967168  ;;  %s24_s29 = sadd.s32 1, %s1652_s29   ;;  %s2095_s24 = smov %s1636_s25 }
 0x6c7   : > { %p21_p11 = scmp.ge.s32.totalorder %s24_s29, 4   ;;  %s2096_s25 = smov %s1640_s26 }
 0x6c8   : > { %s2097_s26 = smov %s1851_s19  ;;  %s2098_s27 = smov %s1648_s28 }
 0x6c9   : > { %s2099_s28 = smov %s2101_s20  ;;  %23 = sbr.rel (!%p21_p11) target bundleno = 7 (0x7), region = 106 }
 0x6d0   :  { %1134 = vsyncpa [#allocation5], 1 }
 0x6d1   :  { %1136 = vsyncpa [#allocation5 + $0x1], 1 }
 0x6d2   :  { %1137 = vsyncpa [#allocation8], 1 }
 0x6d3   :  { %1138 = vsyncpa [#allocation6], 1 }
 0x6d4   :  { %1140 = vsyncpa [#allocation6 + $0x1], 1 }

</bundles_post_ra>
